<compile_context>
chip_gen: v6e
topology: v6e:2x2x1
jax: 0.10.0
libtpu: 0.0.40
codegen_flags: <defaults>
</compile_context>

<pallas_src>
import functools

import numpy as np
import jax
import jax.numpy as jnp
from jax.experimental import pallas as pl
from jax.experimental.pallas import tpu as pltpu


def _ceil_to(x, m):
    return -(-x // m) * m


# -----------------------------------------------------------------------------
# pltpu.roll direction probe.
# The kernel needs "shift(x, d)[t] == x[(t - d) % L]" (numpy roll convention).
# A tiny one-off kernel detects the sign convention of pltpu.roll on this
# backend; if the rotate cannot be used we fall back to jnp.roll (static slices
# + concatenate), which is slower but always correct.
# -----------------------------------------------------------------------------
@functools.lru_cache(maxsize=None)
def _roll_sign():
    try:
        def _k(x_ref, o_ref):
            o_ref[...] = pltpu.roll(x_ref[...], 1, axis=1)

        x = jnp.tile(jnp.arange(128, dtype=jnp.float32)[None, :], (8, 1))
        out = pl.pallas_call(
            _k, out_shape=jax.ShapeDtypeStruct((8, 128), jnp.float32))(x)
        out = np.asarray(jax.block_until_ready(out))
        xin = np.asarray(x)
        if np.array_equal(out, np.roll(xin, 1, axis=1)):
            return 1
        if np.array_equal(out, np.roll(xin, -1, axis=1)):
            return -1
    except Exception:
        pass
    return None  # use the jnp.roll fallback inside the kernel


# -----------------------------------------------------------------------------
# Per-generation block sizing (VMEM capacity branch).
# -----------------------------------------------------------------------------
@functools.lru_cache(maxsize=None)
def _vmem_capacity_bytes():
    try:
        return int(pltpu.get_tpu_info().vmem_capacity_bytes)
    except Exception:
        return 64 * 1024 * 1024  # conservative default (v7x-sized)


def _block_plan(rows8, lanes):
    big_vmem = _vmem_capacity_bytes() >= 100 * 1024 * 1024   # v5e/v6e: 128 MiB
    # ~4 MiB per-array blocks on big-VMEM parts, ~2 MiB on v7x: keeps
    # (2 in + 2 out) x 2 pipeline buffers + ~7 live f32 block temporaries well
    # under the per-part VMEM limit while amortizing the ~0.35 us/step overhead.
    blk_bytes_tgt = (4 << 20) if big_vmem else (2 << 20)
    vmem_limit = (100 << 20) if big_vmem else (48 << 20)
    blk = blk_bytes_tgt // (lanes * 4)
    blk = max(8, min(4096, blk))
    blk -= blk % 8
    blk = min(blk, rows8)
    if rows8 > 8:
        # >= 2 grid steps so both v7x TensorCores get work on the parallel axis.
        blk = min(blk, _ceil_to(-(-rows8 // 2), 8))
    blk = max(8, blk)
    return blk, vmem_limit


# -----------------------------------------------------------------------------
# Kernel: one (row_blk, lanes) block of the packed (rows, lanes) maps.  Each row
# holds `spr` independent length-`seg_len` time series laid out consecutively
# along the lane axis (spr == 1 -> one series per row, zero padding after it).
# -----------------------------------------------------------------------------
def _onset_vel_kernel(pthresh_ref, probs_ref, vel_ref, nms_out_ref, vel_out_ref,
                      *, seg_len, spr, use_masks, gauss_w, nms_half,
                      pad_l, pad_r, roll_sign):
    f32 = jnp.float32
    x = probs_ref[...].astype(f32)
    rows, n_lanes = x.shape
    neg_inf = f32(-jnp.inf)

    def rolled(arr, d):
        # rolled(arr, d)[:, t] == arr[:, (t - d) % n_lanes]  (numpy roll semantics)
        d = d % n_lanes
        if d == 0:
            return arr
        if roll_sign is not None:
            return pltpu.roll(arr, (roll_sign * d) % n_lanes, axis=1)  # XLU slot
        return jnp.roll(arr, d, axis=1)  # fallback: static slices + concat

    # lane position within its segment (built without vector div/mod)
    t_idx = jax.lax.broadcasted_iota(jnp.int32, (rows, n_lanes), 1)
    seg_pos = t_idx
    for s in range(1, spr):
        seg_pos = jnp.where(t_idx >= s * seg_len, t_idx - s * seg_len, seg_pos)

    if use_masks:
        _mask = {}

        def left_ok(j):    # element j lanes to the left exists in the same segment
            if ("L", j) not in _mask:
                _mask[("L", j)] = seg_pos >= j
            return _mask[("L", j)]

        def right_ok(j):   # element j lanes to the right exists in the same segment
            if ("R", j) not in _mask:
                _mask[("R", j)] = seg_pos < (seg_len - j)
            return _mask[("R", j)]

    # ---- Gaussian blur along t (zero padding, unit-sum weights) -------------
    if gauss_w is not None:
        half = len(gauss_w) // 2
        xb = x * f32(gauss_w[half])
        for j in range(1, half + 1):
            lft, rgt = rolled(x, j), rolled(x, -j)          # x[t-j], x[t+j]
            if use_masks:
                lft = jnp.where(left_ok(j), lft, 0.0)
                rgt = jnp.where(right_ok(j), rgt, 0.0)
            # else: lanes seg_len.. hold zeros and every shift <= lane padding,
            # so the raw rolls already realise zero padding.
            xb = xb + f32(gauss_w[half - j]) * lft + f32(gauss_w[half + j]) * rgt
    else:
        xb = x

    # ---- 1-D NMS: MaxPool1d(ksize, stride 1, -inf padding) + keep-if-equal --
    if use_masks:
        hmax = xb
        for j in range(1, nms_half + 1):
            hmax = jnp.maximum(hmax, jnp.where(left_ok(j), rolled(xb, j), neg_inf))
            hmax = jnp.maximum(hmax, jnp.where(right_ok(j), rolled(xb, -j), neg_inf))
    else:
        xn = jnp.where(seg_pos < seg_len, xb, neg_inf)      # one upfront select
        hmax = xn
        for j in range(1, nms_half + 1):
            hmax = jnp.maximum(hmax, jnp.maximum(rolled(xn, j), rolled(xn, -j)))
    res = jnp.where(xb == hmax, xb, f32(0.0))
    # pthresh sentinel -1.0 == "no threshold" (res is always >= 0)
    res = jnp.where(res >= pthresh_ref[0], res, f32(0.0))
    nms_out_ref[...] = res.astype(nms_out_ref.dtype)

    # ---- velocity: reflect-padded window mean along t ------------------------
    v = vel_ref[...].astype(f32)
    _vroll = {}

    def shift_v(d):   # cached: the reflection corrections reuse the main-tap rolls
        d = d % n_lanes
        if d == 0:
            return v
        if d not in _vroll:
            _vroll[d] = rolled(v, d)
        return _vroll[d]

    acc = v
    for j in range(1, pad_r + 1):                           # v[t + j]
        tap = shift_v(-j)
        acc = acc + (jnp.where(right_ok(j), tap, 0.0) if use_masks else tap)
    for j in range(1, pad_l + 1):                           # v[t - j]
        tap = shift_v(j)
        acc = acc + (jnp.where(left_ok(j), tap, 0.0) if use_masks else tap)
    # reflection corrections (each touches <= max(pad) boundary columns):
    # right tap +j is OOB at seg_pos == seg_len-1-m (m<j) -> reflected v[t+2m-j]
    for j in range(1, pad_r + 1):
        for m in range(j):
            s = 2 * m - j
            acc = acc + jnp.where(seg_pos == (seg_len - 1 - m), shift_v(-s), 0.0)
    # left tap -j is OOB at seg_pos == m (m<j) -> reflected v[t+j-2m]
    for j in range(1, pad_l + 1):
        for m in range(j):
            s = j - 2 * m
            acc = acc + jnp.where(seg_pos == m, shift_v(-s), 0.0)
    vel_out_ref[...] = (acc * f32(1.0 / (pad_l + pad_r + 1))).astype(vel_out_ref.dtype)


# -----------------------------------------------------------------------------
# Module wrapper
# -----------------------------------------------------------------------------
class OnsetVelocityNmsDecoder:
    """JAX/Pallas port of the PyTorch OnsetVelocityNmsDecoder forward pass."""

    def __init__(self, num_keys, nms_pool_ksize=3, gauss_conv_stddev=None,
                 gauss_conv_ksize=None, vel_pad_left=1, vel_pad_right=1):
        self.num_keys = num_keys
        assert nms_pool_ksize % 2 == 1, "odd nms_pool_ksize expected"
        self.nms_pool_ksize = nms_pool_ksize
        self.blur = gauss_conv_stddev is not None
        if self.blur:
            if gauss_conv_ksize is None:
                gauss_conv_ksize = round(gauss_conv_stddev * 7)
            assert gauss_conv_ksize % 2 == 1, "odd gauss ksize expected"
            # TODO(synk): GaussianBlur1d source not shown; assuming depthwise
            # "same" conv with zero padding and unit-sum Gaussian weights.
            off = (np.arange(gauss_conv_ksize, dtype=np.float64)
                   - (gauss_conv_ksize - 1) / 2.0)
            g = np.exp(-0.5 * (off / gauss_conv_stddev) ** 2)
            self.gauss_weights = (g / g.sum()).astype(np.float32)
            self.gauss_conv_ksize = gauss_conv_ksize
            self._gauss_half = gauss_conv_ksize // 2
        else:
            self._gauss_half = 0
        self.vel_pad_left = vel_pad_left
        self.vel_pad_right = vel_pad_right

    # ---------- layout planning -------------------------------------------------
    def _layout(self, B, K, T):
        R = B * K
        max_shift = max(self._gauss_half, self.nms_pool_ksize // 2,
                        self.vel_pad_left, self.vel_pad_right)
        if T <= 64 and (128 // T) >= 2:
            # pack several (b, key) series into each 128-lane row
            spr = min(128 // T, 16)
            lanes = 128
            use_masks = True                     # segment-local boundary masks
        else:
            spr = 1
            lanes = _ceil_to(T, 128)
            # mask-free path only valid when the lane zero-padding covers every shift
            use_masks = (lanes - T) < max_shift
        rows_pk = -(-R // spr)
        rows8 = _ceil_to(rows_pk, 8)             # rows padded to a sublane multiple only
        blk, vmem_limit = _block_plan(rows8, lanes)
        grid = -(-rows8 // blk)                  # ragged last block handled by Pallas
        return dict(B=B, K=K, T=T, R=R, spr=spr, lanes=lanes, rows_pk=rows_pk,
                    rows8=rows8, blk=blk, grid=grid, vmem_limit=vmem_limit,
                    use_masks=use_masks)

    @staticmethod
    def _pack(arr2d, lay):
        spr, T = lay["spr"], lay["T"]
        rows_pk, rows8, lanes = lay["rows_pk"], lay["rows8"], lay["lanes"]
        if spr > 1:
            r_pk = rows_pk * spr
            if r_pk != arr2d.shape[0]:
                arr2d = jnp.pad(arr2d, ((0, r_pk - arr2d.shape[0]), (0, 0)))
            arr2d = arr2d.reshape(rows_pk, spr * T)
        r, c = arr2d.shape
        if (r, c) != (rows8, lanes):
            arr2d = jnp.pad(arr2d, ((0, rows8 - r), (0, lanes - c)))  # zeros required
        return arr2d

    @staticmethod
    def _unpack(arr, lay):
        # works for both jnp (device) and numpy (host) arrays
        B, K, T, R = lay["B"], lay["K"], lay["T"], lay["R"]
        spr, rows_pk = lay["spr"], lay["rows_pk"]
        if spr > 1:
            arr = arr[:rows_pk, :spr * T].reshape(rows_pk * spr, T)
        arr = arr[:R, :T]
        return arr.reshape(B, K, T)

    # ---------- dense maps computed by the Pallas kernel ------------------------
    def _dense_padded(self, onset_probs, velmap, pthresh):
        B, K, T = onset_probs.shape
        assert velmap.shape == onset_probs.shape
        assert K == self.num_keys
        assert T > max(self.vel_pad_left, self.vel_pad_right), \
            "reflect padding requires pad < t"
        lay = self._layout(B, K, T)

        probs_p = self._pack(onset_probs.reshape(lay["R"], T), lay)
        vel_p = self._pack(velmap.reshape(lay["R"], T), lay)

        pthresh_arr = jnp.asarray(
            [-1.0 if pthresh is None else float(pthresh)], dtype=jnp.float32)

        kernel = functools.partial(
            _onset_vel_kernel,
            seg_len=T,
            spr=lay["spr"],
            use_masks=lay["use_masks"],
            gauss_w=(tuple(float(w) for w in self.gauss_weights)
                     if self.blur else None),
            nms_half=self.nms_pool_ksize // 2,
            pad_l=self.vel_pad_left,
            pad_r=self.vel_pad_right,
            roll_sign=_roll_sign(),
        )

        blk, lanes = lay["blk"], lay["lanes"]
        blk_spec = pl.BlockSpec((blk, lanes), lambda r, pth: (r, 0))
        grid_spec = pltpu.PrefetchScalarGridSpec(
            num_scalar_prefetch=1,
            grid=(lay["grid"],),
            in_specs=[blk_spec, blk_spec],
            out_specs=[blk_spec, blk_spec],
        )

        nms_pad, vel_pad = pl.pallas_call(
            kernel,
            out_shape=(jax.ShapeDtypeStruct((lay["rows8"], lanes), onset_probs.dtype),
                       jax.ShapeDtypeStruct((lay["rows8"], lanes), velmap.dtype)),
            grid_spec=grid_spec,
            compiler_params=pltpu.CompilerParams(
                dimension_semantics=("parallel",),
                vmem_limit_bytes=lay["vmem_limit"]),
        )(pthresh_arr, probs_p, vel_p)
        return nms_pad, vel_pad, lay

    def dense_maps(self, onset_probs, velmap, pthresh=None):
        nms_pad, vel_pad, lay = self._dense_padded(onset_probs, velmap, pthresh)
        return self._unpack(nms_pad, lay), self._unpack(vel_pad, lay)

    # ---------- forward: dense kernel + host-side sparse extraction -------------
    def __call__(self, onset_probs, velmap, pthresh=None):
        nms_pad, vel_pad, lay = self._dense_padded(onset_probs, velmap, pthresh)
        # single device->host transfer of the padded outputs; unpacking is done
        # with numpy (no extra on-device slice/reshape pass over both maps).
        nms_np = self._unpack(np.asarray(jax.block_until_ready(nms_pad)), lay)
        vel_np = self._unpack(np.asarray(vel_pad), lay)
        bbb, kkk, ttt = np.nonzero(nms_np)
        ppp = nms_np[bbb, kkk, ttt]
        vvv = vel_np[bbb, kkk, ttt]
        # TODO(synk): pandas DataFrame output replaced by a dict of numpy columns
        # (variable-size nonzero extraction has no Pallas equivalent).
        return {"batch_idx": bbb, "key": kkk, "t_idx": ttt, "prob": ppp, "vel": vvv}

    # ---------- plain numpy reference for validation ----------------------------
    def _reference_dense(self, probs, velmap, pthresh=None):
        probs = np.asarray(probs, dtype=np.float32)
        velmap = np.asarray(velmap, dtype=np.float32)
        B, K, T = probs.shape
        if self.blur:
            half = self.gauss_conv_ksize // 2
            xp = np.pad(probs, ((0, 0), (0, 0), (half, half)))
            xb = np.zeros_like(probs)
            for i, w in enumerate(self.gauss_weights):
                xb += np.float32(w) * xp[..., i:i + T]
        else:
            xb = probs.copy()
        nh = self.nms_pool_ksize // 2
        xpad = np.pad(xb, ((0, 0), (0, 0), (nh, nh)), constant_values=-np.inf)
        hmax = np.max(np.stack([xpad[..., i:i + T]
                                for i in range(2 * nh + 1)], 0), 0)
        res = np.where(xb == hmax, xb, 0.0).astype(np.float32)
        if pthresh is not None:
            res = res * (res >= np.float32(pthresh))
        n = self.vel_pad_left + self.vel_pad_right + 1
        vp = np.pad(velmap,
                    ((0, 0), (0, 0), (self.vel_pad_left, self.vel_pad_right)),
                    mode="reflect")
        vel = np.zeros_like(velmap)
        for i in range(n):
            vel += vp[..., i:i + T]
        vel /= np.float32(n)
        return res.astype(np.float32), vel.astype(np.float32)


if __name__ == "__main__":
    key = jax.random.PRNGKey(0)
    keys = jax.random.split(key, 8)

    def run_cfg(kp, kv, B, K, T, dec_kwargs, pthresh, tag):
        probs = jax.random.uniform(kp, (B, K, T), dtype=jnp.float32)       # [0, 1]
        vel = jax.random.uniform(kv, (B, K, T), dtype=jnp.float32) * 127.0
        dec = OnsetVelocityNmsDecoder(num_keys=K, **dec_kwargs)
        nms, velavg = dec.dense_maps(probs, vel, pthresh=pthresh)
        jax.block_until_ready((nms, velavg))
        ref_nms, ref_vel = dec._reference_dense(probs, vel, pthresh=pthresh)
        assert np.allclose(np.asarray(nms), ref_nms, rtol=1e-4, atol=1e-3), \
            f"nms mismatch ({tag})"
        assert np.allclose(np.asarray(velavg), ref_vel, rtol=1e-4, atol=1e-2), \
            f"vel mismatch ({tag})"
        return dec, probs, vel

    # cfg1: packed lanes (T=32 -> 4 series/row), blur + threshold (demo shapes)
    dec1, p1, v1 = run_cfg(keys[0], keys[1], 2, 8, 32,
                           dict(nms_pool_ksize=3, gauss_conv_stddev=1.0,
                                vel_pad_left=1, vel_pad_right=1), 0.5, "cfg1")
    # full forward (kernel + host-side nonzero extraction on the padded outputs)
    out = dec1(p1, v1, pthresh=0.5)
    assert out["prob"].shape == out["vel"].shape == out["t_idx"].shape

    # cfg2: packed (T=40 -> 3 series/row), wider NMS, asymmetric pads, no threshold
    run_cfg(keys[2], keys[3], 3, 5, 40,
            dict(nms_pool_ksize=5, vel_pad_left=2, vel_pad_right=1), None, "cfg2")

    # cfg3: mask-free path (T=200 -> 256 lanes; zero lane padding covers all shifts)
    run_cfg(keys[4], keys[5], 2, 3, 200,
            dict(nms_pool_ksize=3, gauss_conv_stddev=1.0,
                 vel_pad_left=1, vel_pad_right=2), 0.3, "cfg3")

    # cfg4: masked, non-packed path (T=128 -> no lane padding available)
    run_cfg(keys[6], keys[7], 1, 6, 128,
            dict(nms_pool_ksize=3, vel_pad_left=1, vel_pad_right=1), None, "cfg4")

    print("KERNEL_OK")
</pallas_src>

<mosaic_0001>
module attributes {stable_mosaic.version = 11 : i64} {
  func.func @_k(%arg0: memref<8x128xf32, #tpu.memory_space<vmem>>, %arg1: memref<8x128xf32, #tpu.memory_space<vmem>>) attributes {dimension_semantics = [], scalar_prefetch = 0 : i64, scratch_operands = 0 : i64, tpu.core_type = #tpu.core_type<tc>} {
    %c0 = arith.constant 0 : index
    %c0_0 = arith.constant 0 : index
    %0 = vector.load %arg0[%c0, %c0_0] : memref<8x128xf32, #tpu.memory_space<vmem>>, vector<8x128xf32>
    %c1_i32 = arith.constant 1 : i32
    %1 = tpu.dynamic_rotate %0 by %c1_i32 dim 1 : vector<8x128xf32>, i32 -> vector<8x128xf32>
    %c0_1 = arith.constant 0 : index
    %c0_2 = arith.constant 0 : index
    %2 = vector.load %arg1[%c0_1, %c0_2] : memref<8x128xf32, #tpu.memory_space<vmem>>, vector<8x128xf32>
    tpu.vector_store %arg1[%c0_1, %c0_2], %1 {strides = array<i32>} : memref<8x128xf32, #tpu.memory_space<vmem>>, vector<8x128xf32>,
    return
  }
}

module attributes {stable_mosaic.version = 11 : i64} {
  func.func @_onset_vel_kernel(%arg0: i32, %arg1: memref<1xf32, #tpu.memory_space<smem>>, %arg2: memref<8x128xf32, #tpu.memory_space<vmem>>, %arg3: memref<8x128xf32, #tpu.memory_space<vmem>>, %arg4: memref<8x128xf32, #tpu.memory_space<vmem>>, %arg5: memref<8x128xf32, #tpu.memory_space<vmem>>) attributes {dimension_semantics = [#tpu.dimension_semantics<parallel>], iteration_bounds = array<i64: 1>, scalar_prefetch = 1 : i64, scratch_operands = 0 : i64, tpu.core_type = #tpu.core_type<tc>, window_params = [{transform_indices = @transform_0, window_bounds = array<i64: 8, 128>}, {transform_indices = @transform_1, window_bounds = array<i64: 8, 128>}, {transform_indices = @transform_2, window_bounds = array<i64: 8, 128>}, {transform_indices = @transform_3, window_bounds = array<i64: 8, 128>}]} {
    %c0 = arith.constant 0 : index
    %c0_0 = arith.constant 0 : index
    %0 = vector.load %arg2[%c0, %c0_0] : memref<8x128xf32, #tpu.memory_space<vmem>>, vector<8x128xf32>
    %1 = tpu.iota {dimensions = array<i32: 1>} : vector<8x128xi32>
    %c32_i32 = arith.constant 32 : i32
    %2 = vector.broadcast %c32_i32 : i32 to vector<8x128xi32>
    %3 = arith.cmpi sge, %1, %2 : vector<8x128xi32>
    %c32_i32_1 = arith.constant 32 : i32
    %4 = vector.broadcast %c32_i32_1 : i32 to vector<8x128xi32>
    %5 = arith.subi %1, %4 : vector<8x128xi32>
    %6 = arith.select %3, %5, %1 : vector<8x128xi1>, vector<8x128xi32>
    %c64_i32 = arith.constant 64 : i32
    %7 = vector.broadcast %c64_i32 : i32 to vector<8x128xi32>
    %8 = arith.cmpi sge, %1, %7 : vector<8x128xi32>
    %c64_i32_2 = arith.constant 64 : i32
    %9 = vector.broadcast %c64_i32_2 : i32 to vector<8x128xi32>
    %10 = arith.subi %1, %9 : vector<8x128xi32>
    %11 = arith.select %8, %10, %6 : vector<8x128xi1>, vector<8x128xi32>
    %c96_i32 = arith.constant 96 : i32
    %12 = vector.broadcast %c96_i32 : i32 to vector<8x128xi32>
    %13 = arith.cmpi sge, %1, %12 : vector<8x128xi32>
    %c96_i32_3 = arith.constant 96 : i32
    %14 = vector.broadcast %c96_i32_3 : i32 to vector<8x128xi32>
    %15 = arith.subi %1, %14 : vector<8x128xi32>
    %16 = arith.select %13, %15, %11 : vector<8x128xi1>, vector<8x128xi32>
    %cst = arith.constant 0.399050266 : f32
    %17 = vector.broadcast %cst : f32 to vector<8x128xf32>
    %18 = arith.mulf %0, %17 : vector<8x128xf32>
    %19 = vector.extract_strided_slice %0 {offsets = [0, 127], sizes = [8, 1], strides = [1, 1]} : vector<8x128xf32> to vector<8x1xf32>
    %20 = vector.extract_strided_slice %0 {offsets = [0, 0], sizes = [8, 127], strides = [1, 1]} : vector<8x128xf32> to vector<8x127xf32>
    %21 = tpu.concatenate %19, %20 in 1 : vector<8x1xf32>, vector<8x127xf32> -> vector<8x128xf32>
    %22 = vector.extract_strided_slice %0 {offsets = [0, 1], sizes = [8, 127], strides = [1, 1]} : vector<8x128xf32> to vector<8x127xf32>
    %23 = vector.extract_strided_slice %0 {offsets = [0, 0], sizes = [8, 1], strides = [1, 1]} : vector<8x128xf32> to vector<8x1xf32>
    %24 = tpu.concatenate %22, %23 in 1 : vector<8x127xf32>, vector<8x1xf32> -> vector<8x128xf32>
    %c1_i32 = arith.constant 1 : i32
    %25 = vector.broadcast %c1_i32 : i32 to vector<8x128xi32>
    %26 = arith.cmpi sge, %16, %25 : vector<8x128xi32>
    %cst_4 = arith.constant 0.000000e+00 : f32
    %27 = vector.broadcast %cst_4 : f32 to vector<8x128xf32>
    %28 = arith.select %26, %21, %27 : vector<8x128xi1>, vector<8x128xf32>
    %c31_i32 = arith.constant 31 : i32
    %29 = vector.broadcast %c31_i32 : i32 to vector<8x128xi32>
    %30 = arith.cmpi slt, %16, %29 : vector<8x128xi32>
    %cst_5 = arith.constant 0.000000e+00 : f32
    %31 = vector.broadcast %cst_5 : f32 to vector<8x128xf32>
    %32 = arith.select %30, %24, %31 : vector<8x128xi1>, vector<8x128xf32>
    %cst_6 = arith.constant 0.242036223 : f32
    %33 = vector.broadcast %cst_6 : f32 to vector<8x128xf32>
    %34 = arith.mulf %33, %28 : vector<8x128xf32>
    %35 = arith.addf %18, %34 : vector<8x128xf32>
    %cst_7 = arith.constant 0.242036223 : f32
    %36 = vector.broadcast %cst_7 : f32 to vector<8x128xf32>
    %37 = arith.mulf %36, %32 : vector<8x128xf32>
    %38 = arith.addf %35, %37 : vector<8x128xf32>
    %39 = vector.extract_strided_slice %0 {offsets = [0, 126], sizes = [8, 2], strides = [1, 1]} : vector<8x128xf32> to vector<8x2xf32>
    %40 = vector.extract_strided_slice %0 {offsets = [0, 0], sizes = [8, 126], strides = [1, 1]} : vector<8x128xf32> to vector<8x126xf32>
    %41 = tpu.concatenate %39, %40 in 1 : vector<8x2xf32>, vector<8x126xf32> -> vector<8x128xf32>
    %42 = vector.extract_strided_slice %0 {offsets = [0, 2], sizes = [8, 126], strides = [1, 1]} : vector<8x128xf32> to vector<8x126xf32>
    %43 = vector.extract_strided_slice %0 {offsets = [0, 0], sizes = [8, 2], strides = [1, 1]} : vector<8x128xf32> to vector<8x2xf32>
    %44 = tpu.concatenate %42, %43 in 1 : vector<8x126xf32>, vector<8x2xf32> -> vector<8x128xf32>
    %c2_i32 = arith.constant 2 : i32
    %45 = vector.broadcast %c2_i32 : i32 to vector<8x128xi32>
    %46 = arith.cmpi sge, %16, %45 : vector<8x128xi32>
    %cst_8 = arith.constant 0.000000e+00 : f32
    %47 = vector.broadcast %cst_8 : f32 to vector<8x128xf32>
    %48 = arith.select %46, %41, %47 : vector<8x128xi1>, vector<8x128xf32>
    %c30_i32 = arith.constant 30 : i32
    %49 = vector.broadcast %c30_i32 : i32 to vector<8x128xi32>
    %50 = arith.cmpi slt, %16, %49 : vector<8x128xi32>
    %cst_9 = arith.constant 0.000000e+00 : f32
    %51 = vector.broadcast %cst_9 : f32 to vector<8x128xf32>
    %52 = arith.select %50, %44, %51 : vector<8x128xi1>, vector<8x128xf32>
    %cst_10 = arith.constant 0.0540055819 : f32
    %53 = vector.broadcast %cst_10 : f32 to vector<8x128xf32>
    %54 = arith.mulf %53, %48 : vector<8x128xf32>
    %55 = arith.addf %38, %54 : vector<8x128xf32>
    %cst_11 = arith.constant 0.0540055819 : f32
    %56 = vector.broadcast %cst_11 : f32 to vector<8x128xf32>
    %57 = arith.mulf %56, %52 : vector<8x128xf32>
    %58 = arith.addf %55, %57 : vector<8x128xf32>
    %59 = vector.extract_strided_slice %0 {offsets = [0, 125], sizes = [8, 3], strides = [1, 1]} : vector<8x128xf32> to vector<8x3xf32>
    %60 = vector.extract_strided_slice %0 {offsets = [0, 0], sizes = [8, 125], strides = [1, 1]} : vector<8x128xf32> to vector<8x125xf32>
    %61 = tpu.concatenate %59, %60 in 1 : vector<8x3xf32>, vector<8x125xf32> -> vector<8x128xf32>
    %62 = vector.extract_strided_slice %0 {offsets = [0, 3], sizes = [8, 125], strides = [1, 1]} : vector<8x128xf32> to vector<8x125xf32>
    %63 = vector.extract_strided_slice %0 {offsets = [0, 0], sizes = [8, 3], strides = [1, 1]} : vector<8x128xf32> to vector<8x3xf32>
    %64 = tpu.concatenate %62, %63 in 1 : vector<8x125xf32>, vector<8x3xf32> -> vector<8x128xf32>
    %c3_i32 = arith.constant 3 : i32
    %65 = vector.broadcast %c3_i32 : i32 to vector<8x128xi32>
    %66 = arith.cmpi sge, %16, %65 : vector<8x128xi32>
    %cst_12 = arith.constant 0.000000e+00 : f32
    %67 = vector.broadcast %cst_12 : f32 to vector<8x128xf32>
    %68 = arith.select %66, %61, %67 : vector<8x128xi1>, vector<8x128xf32>
    %c29_i32 = arith.constant 29 : i32
    %69 = vector.broadcast %c29_i32 : i32 to vector<8x128xi32>
    %70 = arith.cmpi slt, %16, %69 : vector<8x128xi32>
    %cst_13 = arith.constant 0.000000e+00 : f32
    %71 = vector.broadcast %cst_13 : f32 to vector<8x128xf32>
    %72 = arith.select %70, %64, %71 : vector<8x128xi1>, vector<8x128xf32>
    %cst_14 = arith.constant 0.00443304796 : f32
    %73 = vector.broadcast %cst_14 : f32 to vector<8x128xf32>
    %74 = arith.mulf %73, %68 : vector<8x128xf32>
    %75 = arith.addf %58, %74 : vector<8x128xf32>
    %cst_15 = arith.constant 0.00443304796 : f32
    %76 = vector.broadcast %cst_15 : f32 to vector<8x128xf32>
    %77 = arith.mulf %76, %72 : vector<8x128xf32>
    %78 = arith.addf %75, %77 : vector<8x128xf32>
    %79 = vector.extract_strided_slice %78 {offsets = [0, 127], sizes = [8, 1], strides = [1, 1]} : vector<8x128xf32> to vector<8x1xf32>
    %80 = vector.extract_strided_slice %78 {offsets = [0, 0], sizes = [8, 127], strides = [1, 1]} : vector<8x128xf32> to vector<8x127xf32>
    %81 = tpu.concatenate %79, %80 in 1 : vector<8x1xf32>, vector<8x127xf32> -> vector<8x128xf32>
    %cst_16 = arith.constant 0xFF800000 : f32
    %82 = vector.broadcast %cst_16 : f32 to vector<8x128xf32>
    %83 = arith.select %26, %81, %82 : vector<8x128xi1>, vector<8x128xf32>
    %84 = arith.maximumf %78, %83 : vector<8x128xf32>
    %85 = vector.extract_strided_slice %78 {offsets = [0, 1], sizes = [8, 127], strides = [1, 1]} : vector<8x128xf32> to vector<8x127xf32>
    %86 = vector.extract_strided_slice %78 {offsets = [0, 0], sizes = [8, 1], strides = [1, 1]} : vector<8x128xf32> to vector<8x1xf32>
    %87 = tpu.concatenate %85, %86 in 1 : vector<8x127xf32>, vector<8x1xf32> -> vector<8x128xf32>
    %cst_17 = arith.constant 0xFF800000 : f32
    %88 = vector.broadcast %cst_17 : f32 to vector<8x128xf32>
    %89 = arith.select %30, %87, %88 : vector<8x128xi1>, vector<8x128xf32>
    %90 = arith.maximumf %84, %89 : vector<8x128xf32>
    %91 = arith.cmpf oeq, %78, %90 : vector<8x128xf32>
    %cst_18 = arith.constant 0.000000e+00 : f32
    %92 = vector.broadcast %cst_18 : f32 to vector<8x128xf32>
    %93 = arith.select %91, %78, %92 : vector<8x128xi1>, vector<8x128xf32>
    %c0_19 = arith.constant 0 : index
    %94 = memref.load %arg1[%c0_19] : memref<1xf32, #tpu.memory_space<smem>>
    %95 = vector.broadcast %94 : f32 to vector<8x128xf32>
    %96 = arith.cmpf oge, %93, %95 : vector<8x128xf32>
    %cst_20 = arith.constant 0.000000e+00 : f32
    %97 = vector.broadcast %cst_20 : f32 to vector<8x128xf32>
    %98 = arith.select %96, %93, %97 : vector<8x128xi1>, vector<8x128xf32>
    %c0_21 = arith.constant 0 : index
    %c0_22 = arith.constant 0 : index
    %99 = vector.load %arg4[%c0_21, %c0_22] : memref<8x128xf32, #tpu.memory_space<vmem>>, vector<8x128xf32>
    tpu.vector_store %arg4[%c0_21, %c0_22], %98 {strides = array<i32>} : memref<8x128xf32, #tpu.memory_space<vmem>>, vector<8x128xf32>,
    %c0_23 = arith.constant 0 : index
    %c0_24 = arith.constant 0 : index
    %100 = vector.load %arg3[%c0_23, %c0_24] : memref<8x128xf32, #tpu.memory_space<vmem>>, vector<8x128xf32>
    %101 = vector.extract_strided_slice %100 {offsets = [0, 1], sizes = [8, 127], strides = [1, 1]} : vector<8x128xf32> to vector<8x127xf32>
    %102 = vector.extract_strided_slice %100 {offsets = [0, 0], sizes = [8, 1], strides = [1, 1]} : vector<8x128xf32> to vector<8x1xf32>
    %103 = tpu.concatenate %101, %102 in 1 : vector<8x127xf32>, vector<8x1xf32> -> vector<8x128xf32>
    %cst_25 = arith.constant 0.000000e+00 : f32
    %104 = vector.broadcast %cst_25 : f32 to vector<8x128xf32>
    %105 = arith.select %30, %103, %104 : vector<8x128xi1>, vector<8x128xf32>
    %106 = arith.addf %100, %105 : vector<8x128xf32>
    %107 = vector.extract_strided_slice %100 {offsets = [0, 127], sizes = [8, 1], strides = [1, 1]} : vector<8x128xf32> to vector<8x1xf32>
    %108 = vector.extract_strided_slice %100 {offsets = [0, 0], sizes = [8, 127], strides = [1, 1]} : vector<8x128xf32> to vector<8x127xf32>
    %109 = tpu.concatenate %107, %108 in 1 : vector<8x1xf32>, vector<8x127xf32> -> vector<8x128xf32>
    %cst_26 = arith.constant 0.000000e+00 : f32
    %110 = vector.broadcast %cst_26 : f32 to vector<8x128xf32>
    %111 = arith.select %26, %109, %110 : vector<8x128xi1>, vector<8x128xf32>
    %112 = arith.addf %106, %111 : vector<8x128xf32>
    %c31_i32_27 = arith.constant 31 : i32
    %113 = vector.broadcast %c31_i32_27 : i32 to vector<8x128xi32>
    %114 = arith.cmpi eq, %16, %113 : vector<8x128xi32>
    %cst_28 = arith.constant 0.000000e+00 : f32
    %115 = vector.broadcast %cst_28 : f32 to vector<8x128xf32>
    %116 = arith.select %114, %109, %115 : vector<8x128xi1>, vector<8x128xf32>
    %117 = arith.addf %112, %116 : vector<8x128xf32>
    %c0_i32 = arith.constant 0 : i32
    %118 = vector.broadcast %c0_i32 : i32 to vector<8x128xi32>
    %119 = arith.cmpi eq, %16, %118 : vector<8x128xi32>
    %cst_29 = arith.constant 0.000000e+00 : f32
    %120 = vector.broadcast %cst_29 : f32 to vector<8x128xf32>
    %121 = arith.select %119, %103, %120 : vector<8x128xi1>, vector<8x128xf32>
    %122 = arith.addf %117, %121 : vector<8x128xf32>
    %cst_30 = arith.constant 0.333333343 : f32
    %123 = vector.broadcast %cst_30 : f32 to vector<8x128xf32>
    %124 = arith.mulf %122, %123 : vector<8x128xf32>
    %c0_31 = arith.constant 0 : index
    %c0_32 = arith.constant 0 : index
    %125 = vector.load %arg5[%c0_31, %c0_32] : memref<8x128xf32, #tpu.memory_space<vmem>>, vector<8x128xf32>
    tpu.vector_store %arg5[%c0_31, %c0_32], %124 {strides = array<i32>} : memref<8x128xf32, #tpu.memory_space<vmem>>, vector<8x128xf32>,
    return
  }
  func.func @transform_0(%arg0: i32, %arg1: memref<1xf32, #tpu.memory_space<smem>>) -> (i32, i32) {
    %c0_i32 = arith.constant 0 : i32
    %c0_i32_0 = arith.constant 0 : i32
    return %arg0, %c0_i32 : i32, i32
  }
  func.func @transform_1(%arg0: i32, %arg1: memref<1xf32, #tpu.memory_space<smem>>) -> (i32, i32) {
    %c0_i32 = arith.constant 0 : i32
    %c0_i32_0 = arith.constant 0 : i32
    return %arg0, %c0_i32 : i32, i32
  }
  func.func @transform_2(%arg0: i32, %arg1: memref<1xf32, #tpu.memory_space<smem>>) -> (i32, i32) {
    %c0_i32 = arith.constant 0 : i32
    %c0_i32_0 = arith.constant 0 : i32
    return %arg0, %c0_i32 : i32, i32
  }
  func.func @transform_3(%arg0: i32, %arg1: memref<1xf32, #tpu.memory_space<smem>>) -> (i32, i32) {
    %c0_i32 = arith.constant 0 : i32
    %c0_i32_0 = arith.constant 0 : i32
    return %arg0, %c0_i32 : i32, i32
  }
}

</mosaic_0001>

<bundles_post_ra>
// kernel: tpu_custom_call.1
= control target key start
LH: loop header
LB: loop body
LE: loop exit
PB: predicated region body
PF: predicated region fallthrough
CT: control target
= control target key end

     0   :  { %6 = vsyncpa [#allocation3], 0  ;;  %s106_s0 = inlined_call_operand.hbm [shape: f32[8,128], index: 0, kind: input, shape index: {}]   ;;  %s107_s1 = inlined_call_operand.hbm [shape: f32[8,128], index: 1, kind: output, shape index: {}]  }
   0x1   :  { %7 = vsyncpa [#allocation4], 0  ;;  %s87_s6 = smov [#allocation2]  }
   0x2   :  { %s14_s7 = sshll.u32 %s87_s6, 4  ;;  %s15_s7 = int_to_ptr.vmem [resolvable:$true] %s14_s7 }
   0x3   :  { %s51_s8 = scalar_lea.vmem %s15_s7, 128  ;;  %p56_p1 = scmp.lt.s32.totalorder %s15_s7, %s15_s7 }
   0x4   :  { %p52_p0 = scmp.ne.s32.totalorder %s15_s7, %s51_s8  ;;  %p57_p2 = scmp.lt.s32.totalorder %s51_s8, %s51_s8 }
   0x6   :  { %p58_p3 = por %p57_p2, %p56_p1 }
   0x8   :  { %p59_p4 = pnand %p58_p3, %p52_p0 }
   0xa   :  { %62 = shalt.err (!%p59_p4)
}
   0xb   :  { %17 = dma.hbm_to_vmem [thread:$0]  %s106_s0, 128, %s15_s7, [#allocation3]  }
   0xc   :  { %83 = dma.done.wait [#allocation3], 128  }
   0xd   :  { %84 = vsyncadd [#allocation3], 4294967168  ;;  %v21_v0 = vld [vmem:[#allocation2] sm:$0xff]  ;;  %s88_s11 = smov 1   ;;  %s89_s12 = smov [#allocation5]  }
   0xe   :  { %22 = vrot.lane.b32.xlu0 %v21_v0, %s88_s11  ;;  %s31_s13 = sshll.u32 %s89_s12, 4  ;;  %s32_s13 = int_to_ptr.vmem [resolvable:$true] %s31_s13 }
   0xf   :  { %s63_s14 = scalar_lea.vmem %s32_s13, 128  ;;  %p68_p6 = scmp.lt.s32.totalorder %s32_s13, %s32_s13 }
  0x10   :  { %p64_p5 = scmp.ne.s32.totalorder %s32_s13, %s63_s14  ;;  %p69_p7 = scmp.lt.s32.totalorder %s63_s14, %s63_s14 }
  0x12   :  { %p70_p8 = por %p69_p7, %p68_p6 }
  0x14   :  { %p71_p9 = pnand %p70_p8, %p64_p5 }
  0x80   :  { %v23_v1 = vpop.permute.xlu0 %22 }
  0x81   :  { %24 = vst [vmem:[#allocation5] sm:$0xff] %v23_v1 }
  0x82   :  { %74 = shalt.err (!%p71_p9)
}
  0x83   :  { %34 = dma.vmem_to_hbm [thread:$0]  %s32_s13, 128, %s107_s1, [#allocation4]  }
  0x84   :  { %85 = dma.done.wait [#allocation4], 128  }
  0x85   :  { %86 = vsyncadd [#allocation4], 4294967168 }
  0x86   :  { %38 = vsyncpa [#allocation3], 1 }
  0x87   :  { %39 = vsyncpa [#allocation4], 1 }

// kernel: tpu_custom_call.1
= control target key start
LH: loop header
LB: loop body
LE: loop exit
PB: predicated region body
PF: predicated region fallthrough
CT: control target
= control target key end

     0   :  { %11 = vsyncpa [#allocation5], 0  ;;  %s344_s0 = inlined_call_operand.<no memory space> [shape: f32[1], index: 0, kind: input, shape index: {}]   ;;  %s345_s1 = inlined_call_operand.hbm [shape: f32[8,128], index: 1, kind: input, shape index: {}]   ;;  %s346_s2 = inlined_call_operand.hbm [shape: f32[8,128], index: 2, kind: input, shape index: {}]   ;;  %s347_s3 = inlined_call_operand.hbm [shape: f32[8,128], index: 3, kind: output, shape index: {0}]   ;;  %s348_s4 = inlined_call_operand.hbm [shape: f32[8,128], index: 4, kind: output, shape index: {1}]  }
   0x1   :  { %12 = vsyncpa [#allocation8], 0 }
   0x2   :  { %13 = vsyncpa [#allocation6], 0 }
   0x3   :  { %14 = vsyncpa [#allocation11], 0  ;;  %s266_s15 = smov [#allocation4]   ;;  %s267_s17 = smov [#allocation7]  }
   0x4   :  { %s21_s16 = sshll.u32 %s266_s15, 4  ;;  %s31_s18 = sshll.u32 %s267_s17, 4  ;;  %s22_s16 = int_to_ptr.vmem [resolvable:$true] %s21_s16  ;;  %s32_s18 = int_to_ptr.vmem [resolvable:$true] %s31_s18 }
   0x5   :  { %s186_s19 = scalar_lea.vmem %s22_s16, 128  ;;  %p191_p1 = scmp.lt.s32.totalorder %s22_s16, %s22_s16 }
   0x6   :  { %p187_p0 = scmp.ne.s32.totalorder %s22_s16, %s186_s19  ;;  %p192_p2 = scmp.lt.s32.totalorder %s186_s19, %s186_s19 }
   0x8   :  { %p193_p3 = por %p192_p2, %p191_p1 }
   0xa   :  { %p194_p4 = pnand %p193_p3, %p187_p0 }
   0xc   :  { %197 = shalt.err (!%p194_p4)
}
   0xd   :  { %24 = dma.hbm_to_vmem [thread:$0]  %s345_s1, 128, %s22_s16, [#allocation5]  }
   0xe   :  { %s206_s22 = scalar_lea.vmem %s32_s18, 128  ;;  %p211_p6 = scmp.lt.s32.totalorder %s32_s18, %s32_s18 }
   0xf   :  { %p207_p5 = scmp.ne.s32.totalorder %s32_s18, %s206_s22  ;;  %p212_p7 = scmp.lt.s32.totalorder %s206_s22, %s206_s22 }
  0x11   :  { %p213_p8 = por %p212_p7, %p211_p6 }
  0x13   :  { %p214_p9 = pnand %p213_p8, %p207_p5 }
  0x15   :  { %217 = shalt.err (!%p214_p9)
}
  0x16   :  { %34 = dma.hbm_to_vmem [thread:$0]  %s346_s2, 128, %s32_s18, [#allocation8]  }
  0x17   :  { %258 = dma.done.wait [#allocation5], 128  }
  0x18   :  { %259 = vsyncadd [#allocation5], 4294967168 }
  0x19   :  { %260 = dma.done.wait [#allocation8], 128  }
  0x1a   :  { %261 = vsyncadd [#allocation8], 4294967168  ;;  %v41_v0 = vld [vmem:[#allocation4] sm:$0xff]  ;;  %s268_s25 = smov 1   ;;  %s269_s1 = smov 2   ;;  %v115_v1 = vld [vmem:[#allocation7] sm:$0xff]  ;;  %v42_v2 = vlaneseq }
  0x1b   :  { %55 = vrot.lane.b32.xlu0 %v41_v0, %s268_s25  ;;  %69 = vrot.lane.b32.xlu1 %v41_v0, %s269_s1  ;;  %s270_s26 = smov 127   ;;  %s271_s27 = smov 126   ;;  %v53_v12 = vmul.f32 0.39905027, %v41_v0 }
  0x1c   :  { %s272_s28 = smov 3   ;;  %s273_s29 = smov 125   ;;  %v43_v3 = vand.u32 127, %v42_v2 }
  0x1d   :  { %s274_s2 = smov [#allocation10]  }
  0x1e   :  { %v165_v4 = vadd.s32 4294967264, %v43_v3  ;;  %vm44_vm0 = vcmp.ge.s32.totalorder %v43_v3, 32  ;;  %v166_v5 = vadd.s32 4294967232, %v43_v3  ;;  %vm47_vm1 = vcmp.ge.s32.totalorder %v43_v3, 64  ;;  %s151_s30 = sshll.u32 %s274_s2, 4  ;;  %s152_s30 = int_to_ptr.vmem [resolvable:$true] %s151_s30 }
  0x1f   :  { %58 = vrot.lane.b32.xlu0 %v41_v0, %s270_s26  ;;  %72 = vrot.lane.b32.xlu1 %v41_v0, %s271_s27  ;;  %v167_v7 = vadd.s32 4294967200, %v43_v3  ;;  %vm50_vm2 = vcmp.ge.s32.totalorder %v43_v3, 96  ;;  %s218_s5 = scalar_lea.vmem %s152_s30, 128  ;;  %p223_p11 = scmp.lt.s32.totalorder %s152_s30, %s152_s30 }
  0x20   :  { %v46_v6 = vsel %vm44_vm0, %v165_v4, %v43_v3  ;;  %p219_p10 = scmp.ne.s32.totalorder %s152_s30, %s218_s5  ;;  %p224_p12 = scmp.lt.s32.totalorder %s218_s5, %s218_s5 }
  0x21   :  { %v49_v8 = vsel %vm47_vm1, %v166_v5, %v46_v6 }
  0x22   :  { %v311_v9 = vsel %vm50_vm2, %v167_v7, %v49_v8  ;;  %p225_p13 = por %p224_p12, %p223_p11 }
  0x23   :  { %83 = vrot.lane.b32.xlu0 %v41_v0, %s272_s28  ;;  %86 = vrot.lane.b32.xlu1 %v41_v0, %s273_s29  ;;  %vm61_vm3 = vcmp.ge.s32.totalorder %v311_v9, 1  ;;  %vm75_vm4 = vcmp.ge.s32.totalorder %v311_v9, 2  ;;  %vm63_vm5 = vcmp.lt.s32.totalorder %v311_v9, 31  ;;  %vm77_vm6 = vcmp.lt.s32.totalorder %v311_v9, 30 }
  0x24   :  { %vm89_vm7 = vcmp.ge.s32.totalorder %v311_v9, 3  ;;  %vm91_vm8 = vcmp.lt.s32.totalorder %v311_v9, 29  ;;  %vm127_vm9 = vcmp.eq.s32.totalorder %v311_v9, 31  ;;  %vm130_vm10 = vcmp.eq.s32.totalorder %v311_v9, 0  ;;  %p226_p0 = pnand %p225_p13, %p219_p10 }
  0x27   :  { %117 = vrot.lane.b32.xlu0 %v115_v1, %s270_s26 }
  0x2b   :  { %122 = vrot.lane.b32.xlu0 %v115_v1, %s268_s25 }
  0x8d   :  { %v56_v10 = vpop.permute.xlu0 %55  ;;  %v70_v11 = vpop.permute.xlu1 %69 }
  0x8e   :  { %v62_v13 = vsel %vm61_vm3, %v56_v10, 0.0  ;;  %v76_v17 = vsel %vm75_vm4, %v70_v11, 0.0 }
  0x8f   :  { %v65_v14 = vmul.f32 0.24203622, %v62_v13  ;;  %v79_v22 = vmul.f32 0.054005582, %v76_v17 }
  0x91   :  { %v59_v15 = vpop.permute.xlu0 %58  ;;  %v73_v16 = vpop.permute.xlu1 %72  ;;  %v66_v20 = vadd.f32 %v65_v14, %v53_v12 }
  0x92   :  { %v64_v18 = vsel %vm63_vm5, %v59_v15, 0.0  ;;  %v78_v19 = vsel %vm77_vm6, %v73_v16, 0.0 }
  0x93   :  { %v67_v21 = vmul.f32 0.24203622, %v64_v18  ;;  %v81_v24 = vmul.f32 0.054005582, %v78_v19 }
  0x95   :  { %v68_v23 = vadd.f32 %v67_v21, %v66_v20  ;;  %v84_v25 = vpop.permute.xlu0 %83  ;;  %v87_v26 = vpop.permute.xlu1 %86 }
  0x96   :  { %v90_v27 = vsel %vm89_vm7, %v84_v25, 0.0  ;;  %v92_v28 = vsel %vm91_vm8, %v87_v26, 0.0 }
  0x97   :  { %v80_v29 = vadd.f32 %v79_v22, %v68_v23  ;;  %v93_v30 = vmul.f32 0.004433048, %v90_v27  ;;  %v95_v32 = vmul.f32 0.004433048, %v92_v28 }
  0x99   :  { %v82_v31 = vadd.f32 %v81_v24, %v80_v29  ;;  %v118_v33 = vpop.permute.xlu0 %117 }
  0x9a   :  { %v120_v34 = vsel %vm63_vm5, %v118_v33, 0.0  ;;  %v131_v42 = vsel %vm130_vm10, %v118_v33, 0.0 }
  0x9b   :  { %v94_v35 = vadd.f32 %v93_v30, %v82_v31  ;;  %v121_v36 = vadd.f32 %v120_v34, %v115_v1 }
  0x9d   :  { %v96_v37 = vadd.f32 %v95_v32, %v94_v35  ;;  %v123_v38 = vpop.permute.xlu0 %122 }
  0x9e   :  { %v125_v39 = vsel %vm61_vm3, %v123_v38, 0.0  ;;  %v128_v40 = vsel %vm127_vm9, %v123_v38, 0.0 }
  0x9f   :  { %98 = vrot.lane.b32.xlu1 %v96_v37, %s268_s25  ;;  %v126_v41 = vadd.f32 %v125_v39, %v121_v36 }
  0xa1   :  { %v129_v43 = vadd.f32 %v128_v40, %v126_v41 }
  0xa3   :  { %103 = vrot.lane.b32.xlu1 %v96_v37, %s270_s26  ;;  %v132_v44 = vadd.f32 %v131_v42, %v129_v43 }
  0xa5   :  { %v133_v45 = vmul.f32 0.33333334, %v132_v44 }
  0xa7   :  { %134 = vst [vmem:[#allocation10] sm:$0xff] %v133_v45 }
  0xa8   :  { %229 = shalt.err (!%p226_p0)
}
  0xa9   :  { %154 = dma.vmem_to_hbm [thread:$0]  %s152_s30, 128, %s348_s4, [#allocation11]   ;;  %v111_v52 = vstv %s344_s0 }
  0xaa   :  { %s275_s10 = smov [#allocation9]  }
  0xab   :  { %s141_s11 = sshll.u32 %s275_s10, 4  ;;  %s142_s11 = int_to_ptr.vmem [resolvable:$true] %s141_s11 }
  0xac   :  { %s238_s4 = scalar_lea.vmem %s142_s11, 128  ;;  %p243_p2 = scmp.lt.s32.totalorder %s142_s11, %s142_s11 }
  0xad   :  { %p239_p1 = scmp.ne.s32.totalorder %s142_s11, %s238_s4  ;;  %p244_p3 = scmp.lt.s32.totalorder %s238_s4, %s238_s4 }
  0xaf   :  { %p245_p4 = por %p244_p3, %p243_p2 }
  0xb1   :  { %p246_p5 = pnand %p245_p4, %p239_p1 }
 0x111   :  { %v99_v46 = vpop.permute.xlu1 %98 }
 0x112   :  { %v101_v47 = vsel %vm61_vm3, %v99_v46, -inf }
 0x113   :  { %v102_v48 = vmax.f32 %v96_v37, %v101_v47 }
 0x115   :  { %v104_v49 = vpop.permute.xlu1 %103 }
 0x116   :  { %v106_v50 = vsel %vm63_vm5, %v104_v49, -inf }
 0x117   :  { %v107_v51 = vmax.f32 %v102_v48, %v106_v50 }
 0x119   :  { %vm108_vm11 = vcmp.eq.f32.partialorder %v96_v37, %v107_v51 }
 0x11a   :  { %v109_v53 = vsel %vm108_vm11, %v96_v37, 0.0 }
 0x11b   :  { %vm112_vm12 = vcmp.ge.f32.partialorder %v109_v53, %v111_v52 }
 0x11c   :  { %v113_v54 = vsel %vm112_vm12, %v109_v53, 0.0 }
 0x11d   :  { %114 = vst [vmem:[#allocation9] sm:$0xff] %v113_v54 }
 0x11e   :  { %249 = shalt.err (!%p246_p5)
}
 0x11f   :  { %144 = dma.vmem_to_hbm [thread:$0]  %s142_s11, 128, %s347_s3, [#allocation6]  }
 0x120   :  { %262 = dma.done.wait [#allocation6], 128  }
 0x121   :  { %263 = vsyncadd [#allocation6], 4294967168 }
 0x122   :  { %264 = dma.done.wait [#allocation11], 128  }
 0x123   :  { %265 = vsyncadd [#allocation11], 4294967168 }
 0x124   :  { %161 = vsyncpa [#allocation5], 1 }
 0x125   :  { %162 = vsyncpa [#allocation8], 1 }
 0x126   :  { %163 = vsyncpa [#allocation6], 1 }
 0x127   :  { %164 = vsyncpa [#allocation11], 1 }

</bundles_post_ra>
